<compile_context>
chip_gen: v7x
topology: tpu7x:2x2x1
jax: 0.10.0
libtpu: 0.0.40
codegen_flags: <defaults>
</compile_context>

<pallas_src>
import jax
import jax.numpy as jnp
from jax import lax
from jax.experimental import pallas as pl
from jax.experimental.pallas import tpu as pltpu


def _round_up(x, m):
    return ((x + m - 1) // m) * m


def _amp_mlp_kernel(x_ref, w1_ref, b1_ref, w2_ref, b2_ref, w3_ref, b3_ref,
                    out_ref):
    # x_ref : (TB, F)  f32 tile of flattened events (rows = events)
    # w1    : (F, H) bf16   b1 : (1, H) f32
    # w2    : (H, H) bf16   b2 : (1, H) f32
    # w3    : (1, H) bf16   b3 : (1, 1) f32 scalar in SMEM
    # out   : (1, TB) f32   lane-dense output row (events on the lane axis)
    x = x_ref[...].astype(jnp.bfloat16)                 # VPU cast, hidden under MXU

    # Layer 1: (TB,F) @ (F,H) -> f32, bias in f32, ReLU after bf16 downcast
    h = jnp.dot(x, w1_ref[...], preferred_element_type=jnp.float32) + b1_ref[...]
    h = jnp.maximum(h.astype(jnp.bfloat16), 0)          # (TB, H) bf16

    # Layer 2: (TB,H) @ (H,H)
    h = jnp.dot(h, w2_ref[...], preferred_element_type=jnp.float32) + b2_ref[...]
    h = jnp.maximum(h.astype(jnp.bfloat16), 0)          # (TB, H) bf16

    # Layer 3 (H -> 1), lane-dense: contract w3 (1,H) against h (TB,H) on the
    # trailing H axis of both (== pl.dot trans_b=True) -> (1, TB).  No (TB,H)
    # transpose of h is materialized; the store is an unmasked dense vst.
    out = lax.dot_general(w3_ref[...], h,
                          dimension_numbers=(((1,), (1,)), ((), ())),
                          preferred_element_type=jnp.float32)   # (1, TB)
    out_ref[...] = (out + b3_ref[0, 0]).astype(out_ref.dtype)


def amplitude_mlp_forward(inputs, type_token, global_token, attn_mask, params,
                          *, block_rows=2048):
    """AmplitudeMLPWrapper.forward semantics: type_token / global_token /
    attn_mask are accepted and ignored; inputs are flattened over
    (num_particles, num_components) and fed to the MLP net."""
    del type_token, global_token, attn_mask             # ignored (wrapper spec)
    P, B, N, C = inputs.shape
    F = N * C
    rows = P * B
    x = inputs.reshape(rows, F)                          # free reshape, stays f32

    w1, b1, w2, b2, w3, b3 = params
    H = w1.shape[1]

    # Tile size: multiple of 128 (lane-dense output block), no larger than the
    # padded row count.  Default 2048 amortizes the ~0.35us/step overhead.
    block_rows = max(128, (block_rows // 128) * 128)
    block_rows = min(block_rows, _round_up(rows, 128))
    nblk = pl.cdiv(rows, block_rows)
    rows_pad = nblk * block_rows
    if rows_pad != rows:                                 # ragged tail only
        x = jnp.pad(x, ((0, rows_pad - rows), (0, 0)))

    # Rough per-call VMEM footprint: double-buffered f32 x tile + out row,
    # weights (double-buffered by default), and the per-tile hidden activations.
    weight_bytes = sum(int(a.size) * a.dtype.itemsize for a in (w1, b1, w2, b2, w3))
    vmem_est = (2 * block_rows * F * 4          # x tile, double-buffered
                + 2 * block_rows * 4            # out row, double-buffered
                + 2 * weight_bytes              # resident weights
                + block_rows * H * 6)           # h f32 + bf16 intermediates
    vmem_limit = min(64 * 1024 * 1024,          # v7x physical budget per TC
                     max(32 * 1024 * 1024, 2 * vmem_est))

    cost = pl.CostEstimate(
        flops=2 * rows_pad * (F * H + H * H + H),
        transcendentals=0,
        bytes_accessed=rows_pad * (4 * F + 4) + weight_bytes,
    )

    out = pl.pallas_call(
        _amp_mlp_kernel,
        out_shape=jax.ShapeDtypeStruct((1, rows_pad), jnp.float32),
        grid=(nblk,),
        in_specs=[
            pl.BlockSpec((block_rows, F), lambda i: (i, 0)),    # event tile (pipelined)
            pl.BlockSpec((F, H), lambda i: (0, 0)),             # w1  VMEM-resident
            pl.BlockSpec((1, H), lambda i: (0, 0)),             # b1
            pl.BlockSpec((H, H), lambda i: (0, 0)),             # w2  VMEM-resident
            pl.BlockSpec((1, H), lambda i: (0, 0)),             # b2
            pl.BlockSpec((1, H), lambda i: (0, 0)),             # w3  (final row)
            pl.BlockSpec(memory_space=pltpu.MemorySpace.SMEM),  # b3 scalar
        ],
        out_specs=pl.BlockSpec((1, block_rows), lambda i: (0, i)),
        compiler_params=pltpu.CompilerParams(
            dimension_semantics=("parallel",),                  # megacore on v7x
            vmem_limit_bytes=int(vmem_limit)),
        cost_estimate=cost,
    )(x, w1, b1, w2, b2, w3, b3)

    return out[0, :rows].reshape(P, B, 1)


def make_params(key, in_features, hidden):
    ks = jax.random.split(key, 6)
    scale = 0.1
    w1 = (scale * jax.random.normal(ks[0], (in_features, hidden))).astype(jnp.bfloat16)
    b1 = (0.05 * jax.random.normal(ks[1], (1, hidden))).astype(jnp.float32)
    w2 = (scale * jax.random.normal(ks[2], (hidden, hidden))).astype(jnp.bfloat16)
    b2 = (0.05 * jax.random.normal(ks[3], (1, hidden))).astype(jnp.float32)
    w3 = (scale * jax.random.normal(ks[4], (1, hidden))).astype(jnp.bfloat16)
    b3 = (0.05 * jax.random.normal(ks[5], (1, 1))).astype(jnp.float32)
    return (w1, b1, w2, b2, w3, b3)


def _reference(inputs, params):
    # pure-JAX reference (same bf16 matmul / f32 accumulation recipe)
    P, B, N, C = inputs.shape
    w1, b1, w2, b2, w3, b3 = params
    x = inputs.reshape(P * B, N * C).astype(jnp.bfloat16)
    h = jnp.maximum(jnp.dot(x, w1, preferred_element_type=jnp.float32) + b1, 0.0)
    h = jnp.maximum(jnp.dot(h.astype(jnp.bfloat16), w2,
                            preferred_element_type=jnp.float32) + b2, 0.0)
    out = jnp.dot(h.astype(jnp.bfloat16), w3.T,
                  preferred_element_type=jnp.float32) + b3[0, 0]
    return out.reshape(P, B, 1)


if __name__ == "__main__":
    key = jax.random.PRNGKey(0)
    k_in, k_tok, k_par = jax.random.split(key, 3)

    # nprocesses, batchsize, num_particles, num_components, hidden
    P, B, N, C, H = 2, 128, 8, 4, 128
    inputs = jax.random.normal(k_in, (P, B, N, C), jnp.float32)
    type_token = jax.nn.one_hot(
        jax.random.randint(k_tok, (P, B, N), 0, N), N, dtype=jnp.float32)  # ignored
    global_token = jnp.zeros((P, B, 1), jnp.float32)                       # ignored
    attn_mask = None                                                       # ignored

    params = make_params(k_par, in_features=N * C, hidden=H)

    out = amplitude_mlp_forward(inputs, type_token, global_token, attn_mask, params)
    out = jax.block_until_ready(out)

    ref = _reference(inputs, params)
    assert out.shape == (P, B, 1)
    assert jnp.allclose(out, ref, atol=2e-3, rtol=2e-3), \
        float(jnp.max(jnp.abs(out - ref)))

    print("KERNEL_OK")
</pallas_src>

<mosaic_0001>
module attributes {stable_mosaic.version = 11 : i64} {
  func.func @_amp_mlp_kernel(%arg0: i32, %arg1: memref<256x32xf32, #tpu.memory_space<vmem>>, %arg2: memref<32x128xbf16, #tpu.memory_space<vmem>>, %arg3: memref<1x128xf32, #tpu.memory_space<vmem>>, %arg4: memref<128x128xbf16, #tpu.memory_space<vmem>>, %arg5: memref<1x128xf32, #tpu.memory_space<vmem>>, %arg6: memref<1x128xbf16, #tpu.memory_space<vmem>>, %arg7: memref<1x1xf32, #tpu.memory_space<smem>>, %arg8: memref<1x256xf32, #tpu.memory_space<vmem>>) attributes {dimension_semantics = [#tpu.dimension_semantics<parallel>], iteration_bounds = array<i64: 1>, scalar_prefetch = 0 : i64, scratch_operands = 0 : i64, tpu.core_type = #tpu.core_type<tc>, window_params = [{transform_indices = @transform_0, window_bounds = array<i64: 256, 32>}, {pipeline_mode = #tpu.pipeline_mode<synchronous>, transform_indices = @transform_1, window_bounds = array<i64: 32, 128>}, {pipeline_mode = #tpu.pipeline_mode<synchronous>, transform_indices = @transform_2, window_bounds = array<i64: 1, 128>}, {pipeline_mode = #tpu.pipeline_mode<synchronous>, transform_indices = @transform_3, window_bounds = array<i64: 128, 128>}, {pipeline_mode = #tpu.pipeline_mode<synchronous>, transform_indices = @transform_4, window_bounds = array<i64: 1, 128>}, {pipeline_mode = #tpu.pipeline_mode<synchronous>, transform_indices = @transform_5, window_bounds = array<i64: 1, 128>}, {transform_indices = @transform_6, window_bounds = array<i64: 1, 1>}, {transform_indices = @transform_7, window_bounds = array<i64: 1, 256>}]} {
    %c0 = arith.constant 0 : index
    %c0_0 = arith.constant 0 : index
    %0 = vector.load %arg1[%c0, %c0_0] : memref<256x32xf32, #tpu.memory_space<vmem>>, vector<256x32xf32>
    %1 = arith.truncf %0 : vector<256x32xf32> to vector<256x32xbf16>
    %c0_1 = arith.constant 0 : index
    %c0_2 = arith.constant 0 : index
    %2 = vector.load %arg2[%c0_1, %c0_2] : memref<32x128xbf16, #tpu.memory_space<vmem>>, vector<32x128xbf16>
    %cst = arith.constant dense<0.000000e+00> : vector<256x128xf32>
    %3 = tpu.matmul %1, %2, %cst {dimension_numbers = #tpu.dot_dimension_numbers<[1], [0], [0], [1], [0, 0, 1, 1], [], []>} : vector<256x32xbf16>, vector<32x128xbf16>, vector<256x128xf32> -> vector<256x128xf32>
    %c0_3 = arith.constant 0 : index
    %c0_4 = arith.constant 0 : index
    %4 = vector.load %arg3[%c0_3, %c0_4] : memref<1x128xf32, #tpu.memory_space<vmem>>, vector<1x128xf32>
    %5 = vector.broadcast %4 : vector<1x128xf32> to vector<256x128xf32>
    %6 = arith.addf %3, %5 : vector<256x128xf32>
    %7 = arith.truncf %6 : vector<256x128xf32> to vector<256x128xbf16>
    %cst_5 = arith.constant 0.000000e+00 : bf16
    %8 = vector.broadcast %cst_5 : bf16 to vector<256x128xbf16>
    %9 = arith.maximumf %7, %8 : vector<256x128xbf16>
    %c0_6 = arith.constant 0 : index
    %c0_7 = arith.constant 0 : index
    %10 = vector.load %arg4[%c0_6, %c0_7] : memref<128x128xbf16, #tpu.memory_space<vmem>>, vector<128x128xbf16>
    %cst_8 = arith.constant dense<0.000000e+00> : vector<256x128xf32>
    %11 = tpu.matmul %9, %10, %cst_8 {dimension_numbers = #tpu.dot_dimension_numbers<[1], [0], [0], [1], [0, 0, 1, 1], [], []>} : vector<256x128xbf16>, vector<128x128xbf16>, vector<256x128xf32> -> vector<256x128xf32>
    %c0_9 = arith.constant 0 : index
    %c0_10 = arith.constant 0 : index
    %12 = vector.load %arg5[%c0_9, %c0_10] : memref<1x128xf32, #tpu.memory_space<vmem>>, vector<1x128xf32>
    %13 = vector.broadcast %12 : vector<1x128xf32> to vector<256x128xf32>
    %14 = arith.addf %11, %13 : vector<256x128xf32>
    %15 = arith.truncf %14 : vector<256x128xf32> to vector<256x128xbf16>
    %cst_11 = arith.constant 0.000000e+00 : bf16
    %16 = vector.broadcast %cst_11 : bf16 to vector<256x128xbf16>
    %17 = arith.maximumf %15, %16 : vector<256x128xbf16>
    %c0_12 = arith.constant 0 : index
    %c0_13 = arith.constant 0 : index
    %18 = vector.load %arg6[%c0_12, %c0_13] : memref<1x128xbf16, #tpu.memory_space<vmem>>, vector<1x128xbf16>
    %cst_14 = arith.constant dense<0.000000e+00> : vector<1x256xf32>
    %19 = tpu.matmul %18, %17, %cst_14 {dimension_numbers = #tpu.dot_dimension_numbers<[1], [1], [0], [0], [0, 0, 1, 0], [], []>} : vector<1x128xbf16>, vector<256x128xbf16>, vector<1x256xf32> -> vector<1x256xf32>
    %c0_15 = arith.constant 0 : index
    %c0_16 = arith.constant 0 : index
    %20 = memref.load %arg7[%c0_15, %c0_16] : memref<1x1xf32, #tpu.memory_space<smem>>
    %21 = vector.broadcast %20 : f32 to vector<1x256xf32>
    %22 = arith.addf %19, %21 : vector<1x256xf32>
    %c0_17 = arith.constant 0 : index
    %c0_18 = arith.constant 0 : index
    %23 = vector.load %arg8[%c0_17, %c0_18] : memref<1x256xf32, #tpu.memory_space<vmem>>, vector<1x256xf32>
    tpu.vector_store %arg8[%c0_17, %c0_18], %22 {strides = array<i32>} : memref<1x256xf32, #tpu.memory_space<vmem>>, vector<1x256xf32>,
    return
  }
  func.func @transform_0(%arg0: i32) -> (i32, i32) {
    %c0_i32 = arith.constant 0 : i32
    %c0_i32_0 = arith.constant 0 : i32
    return %arg0, %c0_i32 : i32, i32
  }
  func.func @transform_1(%arg0: i32) -> (i32, i32) {
    %c0_i32 = arith.constant 0 : i32
    %c0_i32_0 = arith.constant 0 : i32
    %c0_i32_1 = arith.constant 0 : i32
    return %c0_i32, %c0_i32_0 : i32, i32
  }
  func.func @transform_2(%arg0: i32) -> (i32, i32) {
    %c0_i32 = arith.constant 0 : i32
    %c0_i32_0 = arith.constant 0 : i32
    %c0_i32_1 = arith.constant 0 : i32
    return %c0_i32, %c0_i32_0 : i32, i32
  }
  func.func @transform_3(%arg0: i32) -> (i32, i32) {
    %c0_i32 = arith.constant 0 : i32
    %c0_i32_0 = arith.constant 0 : i32
    %c0_i32_1 = arith.constant 0 : i32
    return %c0_i32, %c0_i32_0 : i32, i32
  }
  func.func @transform_4(%arg0: i32) -> (i32, i32) {
    %c0_i32 = arith.constant 0 : i32
    %c0_i32_0 = arith.constant 0 : i32
    %c0_i32_1 = arith.constant 0 : i32
    return %c0_i32, %c0_i32_0 : i32, i32
  }
  func.func @transform_5(%arg0: i32) -> (i32, i32) {
    %c0_i32 = arith.constant 0 : i32
    %c0_i32_0 = arith.constant 0 : i32
    %c0_i32_1 = arith.constant 0 : i32
    return %c0_i32, %c0_i32_0 : i32, i32
  }
  func.func @transform_6(%arg0: i32) -> (i32, i32) {
    %c0_i32 = arith.constant 0 : i32
    %c0_i32_0 = arith.constant 0 : i32
    %c0_i32_1 = arith.constant 0 : i32
    return %c0_i32, %c0_i32_0 : i32, i32
  }
  func.func @transform_7(%arg0: i32) -> (i32, i32) {
    %c0_i32 = arith.constant 0 : i32
    %c0_i32_0 = arith.constant 0 : i32
    return %c0_i32, %arg0 : i32, i32
  }
}

</mosaic_0001>

<bundles_post_ra>
// kernel: tpu_custom_call.1
= control target key start
LH: loop header
LB: loop body
LE: loop exit
PB: predicated region body
PF: predicated region fallthrough
CT: control target
= control target key end

     0   :  { %vm100_vm0 = vcmask 261120   ;;  %s1266_s0 = inlined_call_operand.vmem [shape: f32[256,32], index: 0, kind: input, shape index: {}]   ;;  %s1267_s1 = inlined_call_operand.vmem [shape: bf16[32,128], index: 1, kind: input, shape index: {}]   ;;  %s1268_s2 = inlined_call_operand.vmem [shape: f32[1,128], index: 2, kind: input, shape index: {}]   ;;  %s1269_s3 = inlined_call_operand.vmem [shape: bf16[128,128], index: 3, kind: input, shape index: {}]   ;;  %s1270_s4 = inlined_call_operand.vmem [shape: f32[1,128], index: 4, kind: input, shape index: {}]   ;;  %s1271_s5 = inlined_call_operand.vmem [shape: bf16[1,128], index: 5, kind: input, shape index: {}]   ;;  %s1272_s6 = inlined_call_operand.<no memory space> [shape: f32[1,1], index: 6, kind: input, shape index: {}]   ;;  %s1273_s7 = inlined_call_operand.hbm [shape: f32[1,256], index: 7, kind: output, shape index: {}]  }
   0x1   :  { %v862_v0 = vld [vmem:[%s1267_s1] sm:$0xff]   ;;  %v863_v1 = vld [vmem:[%s1267_s1 + $0x8] sm:$0xff]   ;;  %v31_v5 = vld [vmem:[%s1266_s0 + $0x10] sm:$0xff] }
   0x2   :  { %775 = vmatprep.subr.bf16.mxu0 %v862_v0  ;;  %v29_v2 = vld [vmem:[%s1266_s0] sm:$0xff]  ;;  %v30_v3 = vld [vmem:[%s1266_s0 + $0x8] sm:$0xff]  ;;  %v32_v6 = vld [vmem:[%s1266_s0 + $0x18] sm:$0xff] }
   0x3   :  { %776 = vmatpush3.bf16.msra.mxu0 %v862_v0  ;;  %v61_v4 = vpack.c.bf16 %v30_v3, %v29_v2  ;;  %v33_v7 = vld [vmem:[%s1266_s0 + $0x20] sm:$0xff]  ;;  %v34_v8 = vld [vmem:[%s1266_s0 + $0x28] sm:$0xff]  ;;  %v62_v9 = vpack.c.bf16 %v32_v6, %v31_v5  ;;  %v35_v11 = vld [vmem:[%s1266_s0 + $0x30] sm:$0xff] }
   0x4   :  { %777 = vmatprep.subr.bf16.mxu0 %v863_v1  ;;  %v63_v10 = vpack.c.bf16 %v34_v8, %v33_v7  ;;  %v36_v12 = vld [vmem:[%s1266_s0 + $0x38] sm:$0xff]  ;;  %v37_v13 = vld [vmem:[%s1266_s0 + $0x40] sm:$0xff]  ;;  %v38_v14 = vld [vmem:[%s1266_s0 + $0x48] sm:$0xff] }
   0x5   :  { %779 = vmatprep.mubr.msk.bf16.mxu0 %vm100_vm0, %v61_v4  ;;  %v864_v15 = vld [vmem:[%s1269_s3] sm:$0xff]   ;;  %v64_v16 = vpack.c.bf16 %v36_v12, %v35_v11  ;;  %v865_v17 = vld [vmem:[%s1269_s3 + $0x8] sm:$0xff]   ;;  %v65_v18 = vpack.c.bf16 %v38_v14, %v37_v13  ;;  %v39_v19 = vld [vmem:[%s1266_s0 + $0x50] sm:$0xff] }
   0x6   :  { %811 = vmatprep.subr.bf16.mxu1 %v864_v15  ;;  %v866_v20 = vld [vmem:[%s1269_s3 + $0x10] sm:$0xff]   ;;  %v40_v21 = vld [vmem:[%s1266_s0 + $0x58] sm:$0xff]  ;;  %v41_v22 = vld [vmem:[%s1266_s0 + $0x60] sm:$0xff] }
   0x7   :  { %778 = vmatpush3.bf16.msra.mxu0 %v863_v1  ;;  %812 = vmatpush3.bf16.msra.mxu1 %v864_v15  ;;  %v42_v23 = vld [vmem:[%s1266_s0 + $0x68] sm:$0xff] }
   0x8   :  { %813 = vmatprep.subr.bf16.mxu1 %v865_v17 }
   0xa   :  { %780 = vmatmul.mubr.msk.bf16.vlgmr.msra.gmra.mrb[0].mxu0 %vm100_vm0, %v62_v9 }
   0xb   :  { %783 = vmatprep.mubr.msk.bf16.mxu0 %vm100_vm0, %v63_v10  ;;  %814 = vmatpush3.bf16.msra.mxu1 %v865_v17 }
  0x12   :  { %784 = vmatmul.mubr.msk.bf16.gmra.mrb[4].mxu0 %vm100_vm0, %v64_v16 }
  0x13   :  { %787 = vmatprep.mubr.msk.bf16.mxu0 %vm100_vm0, %v65_v18 }
  0x14   :  { %13 = vsyncpa [#allocation4], 0  ;;  %815 = vmatprep.subr.bf16.mxu1 %v866_v20  ;;  %v867_v24 = vld [vmem:[%s1269_s3 + $0x18] sm:$0xff]   ;;  %v66_v25 = vpack.c.bf16 %v40_v21, %v39_v19  ;;  %v67_v26 = vpack.c.bf16 %v42_v23, %v41_v22  ;;  %v868_v27 = vld [vmem:[%s1269_s3 + $0x20] sm:$0xff]   ;;  %v896_v6 = vmov 0   ;;  %s898_s15 = smov [#allocation3]  }
  0x15   :  { %816 = vmatpush3.bf16.msra.mxu1 %v866_v20  ;;  %v43_v28 = vld [vmem:[%s1266_s0 + $0x70] sm:$0xff]  ;;  %v44_v29 = vld [vmem:[%s1266_s0 + $0x78] sm:$0xff]  ;;  %v45_v30 = vld [vmem:[%s1266_s0 + $0x80] sm:$0xff]  ;;  %s679_s16 = sshll.u32 %s898_s15, 4  ;;  %s680_s16 = int_to_ptr.vmem [resolvable:$true] %s679_s16 }
  0x16   :  { %817 = vmatprep.subr.bf16.mxu1 %v867_v24  ;;  %v46_v31 = vld [vmem:[%s1266_s0 + $0x88] sm:$0xff]  ;;  %v68_v33 = vpack.c.bf16 %v44_v29, %v43_v28  ;;  %v47_v35 = vld [vmem:[%s1266_s0 + $0x90] sm:$0xff]  ;;  %v48_v36 = vld [vmem:[%s1266_s0 + $0x98] sm:$0xff]  ;;  %s872_s17 = scalar_lea.vmem %s680_s16, 32  ;;  %p877_p1 = scmp.lt.s32.totalorder %s680_s16, %s680_s16 }
  0x17   :  { %v869_v32 = vld [vmem:[%s1269_s3 + $0x28] sm:$0xff]   ;;  %v69_v34 = vpack.c.bf16 %v46_v31, %v45_v30  ;;  %v49_v37 = vld [vmem:[%s1266_s0 + $0xa0] sm:$0xff]  ;;  %v70_v39 = vpack.c.bf16 %v48_v36, %v47_v35  ;;  %v51_v41 = vld [vmem:[%s1266_s0 + $0xb0] sm:$0xff]  ;;  %p873_p0 = scmp.ne.s32.totalorder %s680_s16, %s872_s17  ;;  %p878_p2 = scmp.lt.s32.totalorder %s872_s17, %s872_s17 }
  0x18   :  { %v50_v38 = vld [vmem:[%s1266_s0 + $0xa8] sm:$0xff]  ;;  %v52_v42 = vld [vmem:[%s1266_s0 + $0xb8] sm:$0xff]  ;;  %v53_v43 = vld [vmem:[%s1266_s0 + $0xc0] sm:$0xff] }
  0x19   :  { %818 = vmatpush3.bf16.msra.mxu1 %v867_v24  ;;  %v71_v40 = vpack.c.bf16 %v50_v38, %v49_v37  ;;  %v54_v44 = vld [vmem:[%s1266_s0 + $0xc8] sm:$0xff]  ;;  %v72_v45 = vpack.c.bf16 %v52_v42, %v51_v41  ;;  %v55_v47 = vld [vmem:[%s1266_s0 + $0xd0] sm:$0xff]  ;;  %v56_v48 = vld [vmem:[%s1266_s0 + $0xd8] sm:$0xff]  ;;  %p879_p3 = por %p878_p2, %p877_p1 }
  0x1a   :  { %788 = vmatmul.mubr.msk.bf16.gmra.mrb[8].mxu0 %vm100_vm0, %v66_v25  ;;  %819 = vmatprep.subr.bf16.mxu1 %v868_v27  ;;  %v73_v46 = vpack.c.bf16 %v54_v44, %v53_v43  ;;  %v57_v49 = vld [vmem:[%s1266_s0 + $0xe0] sm:$0xff]  ;;  %v58_v50 = vld [vmem:[%s1266_s0 + $0xe8] sm:$0xff]  ;;  %v74_v51 = vpack.c.bf16 %v56_v48, %v55_v47  ;;  %v59_v53 = vld [vmem:[%s1266_s0 + $0xf0] sm:$0xff] }
  0x1b   :  { %791 = vmatprep.mubr.msk.bf16.mxu0 %vm100_vm0, %v67_v26  ;;  %v75_v52 = vpack.c.bf16 %v58_v50, %v57_v49  ;;  %v60_v54 = vld [vmem:[%s1266_s0 + $0xf8] sm:$0xff]  ;;  %v870_v56 = vld [vmem:[%s1269_s3 + $0x30] sm:$0xff]   ;;  %v1084_v59 = vld [vmem:[%s1268_s2] ss:$0 sm:$0xff]  ;;  %p880_p4 = pnand %p879_p3, %p873_p0 }
  0x1c   :  { %v76_v55 = vpack.c.bf16 %v60_v54, %v59_v53  ;;  %v871_v57 = vld [vmem:[%s1269_s3 + $0x38] sm:$0xff]  }
  0x1d   :  { %820 = vmatpush3.bf16.msra.mxu1 %v868_v27 }
  0x1e   :  { %821 = vmatprep.subr.bf16.mxu1 %v869_v32 }
  0x21   :  { %822 = vmatpush3.bf16.msra.mxu1 %v869_v32 }
  0x22   :  { %792 = vmatmul.mubr.msk.bf16.gmra.mrb[12].mxu0 %vm100_vm0, %v68_v33  ;;  %823 = vmatprep.subr.bf16.mxu1 %v870_v56 }
  0x23   :  { %795 = vmatprep.mubr.msk.bf16.mxu0 %vm100_vm0, %v69_v34 }
  0x25   :  { %824 = vmatpush3.bf16.msra.mxu1 %v870_v56 }
  0x26   :  { %825 = vmatprep.subr.bf16.mxu1 %v871_v57 }
  0x29   :  { %826 = vmatpush3.bf16.msra.mxu1 %v871_v57 }
  0x2a   :  { %796 = vmatmul.mubr.msk.bf16.gmra.mrb[16].mxu0 %vm100_vm0, %v70_v39 }
  0x2b   :  { %799 = vmatprep.mubr.msk.bf16.mxu0 %vm100_vm0, %v71_v40 }
  0x32   :  { %800 = vmatmul.mubr.msk.bf16.gmra.mrb[20].mxu0 %vm100_vm0, %v72_v45 }
  0x33   :  { %803 = vmatprep.mubr.msk.bf16.mxu0 %vm100_vm0, %v73_v46 }
  0x3a   :  { %804 = vmatmul.mubr.msk.bf16.gmra.mrb[24].mxu0 %vm100_vm0, %v74_v51 }
  0x3b   :  { %807 = vmatprep.mubr.msk.bf16.mxu0 %vm100_vm0, %v75_v52 }
  0x42   :  { %808 = vmatmul.mubr.msk.bf16.gmra.mrb[28].mxu0 %vm100_vm0, %v76_v55 }
  0xdd   :  { %v781_v58 = vpop.f32.mrb[0].mxu0 }
  0xde   :  { %v183_v60 = vpop.f32.mrb[1].mxu0  ;;  %v192_v62 = vadd.f32 %v781_v58, %v1084_v59 }
  0xdf   :  { %v782_v61 = vpop.f32.mrb[2].mxu0  ;;  %v184_v1 = vadd.f32 %v1084_v59, %v183_v60 }
  0xe0   :  { %v195_v63 = vadd.f32 %v782_v61, %v1084_v59  ;;  %v186_v0 = vpop.f32.mrb[3].mxu0 }
  0xe1   :  { %v187_v2 = vadd.f32 %v1084_v59, %v186_v0 }
  0xe2   :  { %v311_v3 = vpack.c.bf16 %v195_v63, %v192_v62 }
  0xe3   :  { %v310_v4 = vpack.c.bf16 %v187_v2, %v184_v1 }
  0xe4   :  { %v327_v9 = vmax.bf16 %v896_v6, %v311_v3 }
  0xe5   :  { %v785_v5 = vpop.f32.mrb[4].mxu0  ;;  %v326_v7 = vmax.bf16 %v896_v6, %v310_v4 }
  0xe6   :  { %v199_v8 = vpop.f32.mrb[5].mxu0  ;;  %v208_v11 = vadd.f32 %v785_v5, %v1084_v59 }
  0xe7   :  { %v786_v10 = vpop.f32.mrb[6].mxu0  ;;  %827 = vmatprep.mubr.bf16.mxu1 %v326_v7  ;;  %v200_v14 = vadd.f32 %v1084_v59, %v199_v8 }
  0xe8   :  { %v211_v12 = vadd.f32 %v786_v10, %v1084_v59  ;;  %v202_v13 = vpop.f32.mrb[7].mxu0  ;;  %828 = vmatmul.mubr.bf16.vlgmr.msra.gmra.mrb[0].mxu1 %v327_v9 }
  0xe9   :  { %v203_v15 = vadd.f32 %v1084_v59, %v202_v13 }
  0xea   :  { %v313_v16 = vpack.c.bf16 %v211_v12, %v208_v11 }
  0xeb   :  { %v312_v17 = vpack.c.bf16 %v203_v15, %v200_v14 }
  0xec   :  { %v329_v21 = vmax.bf16 %v896_v6, %v313_v16 }
  0xed   :  { %v789_v18 = vpop.f32.mrb[8].mxu0  ;;  %v328_v19 = vmax.bf16 %v896_v6, %v312_v17 }
  0xee   :  { %v215_v20 = vpop.f32.mrb[9].mxu0  ;;  %v224_v23 = vadd.f32 %v789_v18, %v1084_v59 }
  0xef   :  { %v790_v22 = vpop.f32.mrb[10].mxu0  ;;  %831 = vmatprep.mubr.bf16.mxu1 %v328_v19  ;;  %v216_v26 = vadd.f32 %v1084_v59, %v215_v20 }
  0xf0   :  { %v227_v24 = vadd.f32 %v790_v22, %v1084_v59  ;;  %v218_v25 = vpop.f32.mrb[11].mxu0  ;;  %832 = vmatmul.mubr.bf16.gmra.mrb[4].mxu1 %v329_v21 }
  0xf1   :  { %v219_v27 = vadd.f32 %v1084_v59, %v218_v25 }
  0xf2   :  { %v315_v28 = vpack.c.bf16 %v227_v24, %v224_v23 }
  0xf3   :  { %v314_v29 = vpack.c.bf16 %v219_v27, %v216_v26 }
  0xf4   :  { %v331_v33 = vmax.bf16 %v896_v6, %v315_v28 }
  0xf5   :  { %v793_v30 = vpop.f32.mrb[12].mxu0  ;;  %v330_v31 = vmax.bf16 %v896_v6, %v314_v29 }
  0xf6   :  { %v231_v32 = vpop.f32.mrb[13].mxu0  ;;  %v240_v35 = vadd.f32 %v793_v30, %v1084_v59  ;;  %v1137_v30 = vld [vmem:[%s1271_s5] sm:$0x1] }
  0xf7   :  { %v794_v34 = vpop.f32.mrb[14].mxu0  ;;  %835 = vmatprep.mubr.bf16.mxu1 %v330_v31  ;;  %v232_v38 = vadd.f32 %v1084_v59, %v231_v32  ;;  %773 = vmatprep.mubr.bf16.mxu0 %v1137_v30 }
  0xf8   :  { %v243_v36 = vadd.f32 %v794_v34, %v1084_v59  ;;  %v234_v37 = vpop.f32.mrb[15].mxu0  ;;  %836 = vmatmul.mubr.bf16.gmra.mrb[8].mxu1 %v331_v33 }
  0xf9   :  { %v235_v39 = vadd.f32 %v1084_v59, %v234_v37 }
  0xfa   :  { %v317_v40 = vpack.c.bf16 %v243_v36, %v240_v35 }
  0xfb   :  { %v316_v41 = vpack.c.bf16 %v235_v39, %v232_v38 }
  0xfc   :  { %v333_v45 = vmax.bf16 %v896_v6, %v317_v40 }
  0xfd   :  { %v797_v42 = vpop.f32.mrb[16].mxu0  ;;  %v332_v43 = vmax.bf16 %v896_v6, %v316_v41 }
  0xfe   :  { %v247_v44 = vpop.f32.mrb[17].mxu0  ;;  %v256_v47 = vadd.f32 %v797_v42, %v1084_v59 }
  0xff   :  { %v798_v46 = vpop.f32.mrb[18].mxu0  ;;  %839 = vmatprep.mubr.bf16.mxu1 %v332_v43  ;;  %v248_v50 = vadd.f32 %v1084_v59, %v247_v44 }
 0x100   :  { %v259_v48 = vadd.f32 %v798_v46, %v1084_v59  ;;  %v250_v49 = vpop.f32.mrb[19].mxu0  ;;  %840 = vmatmul.mubr.bf16.gmra.mrb[12].mxu1 %v333_v45 }
 0x101   :  { %v251_v51 = vadd.f32 %v1084_v59, %v250_v49 }
 0x102   :  { %v319_v52 = vpack.c.bf16 %v259_v48, %v256_v47 }
 0x103   :  { %v318_v53 = vpack.c.bf16 %v251_v51, %v248_v50 }
 0x104   :  { %v335_v58 = vmax.bf16 %v896_v6, %v319_v52 }
 0x105   :  { %v801_v54 = vpop.f32.mrb[20].mxu0  ;;  %v334_v55 = vmax.bf16 %v896_v6, %v318_v53 }
 0x106   :  { %v272_v56 = vadd.f32 %v801_v54, %v1084_v59  ;;  %v263_v57 = vpop.f32.mrb[21].mxu0 }
 0x107   :  { %v264_v60 = vadd.f32 %v1084_v59, %v263_v57  ;;  %843 = vmatprep.mubr.bf16.mxu1 %v334_v55  ;;  %v802_v61 = vpop.f32.mrb[22].mxu0 }
 0x108   :  { %v275_v62 = vadd.f32 %v802_v61, %v1084_v59  ;;  %844 = vmatmul.mubr.bf16.gmra.mrb[16].mxu1 %v335_v58  ;;  %v266_v63 = vpop.f32.mrb[23].mxu0 }
 0x109   :  { %v267_v0 = vadd.f32 %v1084_v59, %v266_v63 }
 0x10a   :  { %v321_v1 = vpack.c.bf16 %v275_v62, %v272_v56 }
 0x10b   :  { %v320_v2 = vpack.c.bf16 %v267_v0, %v264_v60 }
 0x10c   :  { %v337_v3 = vmax.bf16 %v896_v6, %v321_v1 }
 0x10d   :  { %v336_v4 = vmax.bf16 %v896_v6, %v320_v2  ;;  %v805_v5 = vpop.f32.mrb[24].mxu0 }
 0x10e   :  { %v288_v7 = vadd.f32 %v805_v5, %v1084_v59  ;;  %v279_v8 = vpop.f32.mrb[25].mxu0 }
 0x10f   :  { %847 = vmatprep.mubr.bf16.mxu1 %v336_v4  ;;  %v280_v9 = vadd.f32 %v1084_v59, %v279_v8  ;;  %v806_v10 = vpop.f32.mrb[26].mxu0 }
 0x110   :  { %848 = vmatmul.mubr.bf16.gmra.mrb[20].mxu1 %v337_v3  ;;  %v291_v11 = vadd.f32 %v806_v10, %v1084_v59  ;;  %v282_v12 = vpop.f32.mrb[27].mxu0 }
 0x111   :  { %v283_v13 = vadd.f32 %v1084_v59, %v282_v12 }
 0x112   :  { %v323_v14 = vpack.c.bf16 %v291_v11, %v288_v7 }
 0x113   :  { %v322_v15 = vpack.c.bf16 %v283_v13, %v280_v9 }
 0x114   :  { %v339_v16 = vmax.bf16 %v896_v6, %v323_v14 }
 0x115   :  { %v338_v17 = vmax.bf16 %v896_v6, %v322_v15  ;;  %v809_v18 = vpop.f32.mrb[28].mxu0 }
 0x116   :  { %v304_v19 = vadd.f32 %v809_v18, %v1084_v59  ;;  %v295_v20 = vpop.f32.mrb[29].mxu0 }
 0x117   :  { %851 = vmatprep.mubr.bf16.mxu1 %v338_v17  ;;  %v296_v21 = vadd.f32 %v1084_v59, %v295_v20  ;;  %v810_v22 = vpop.f32.mrb[30].mxu0 }
 0x118   :  { %852 = vmatmul.mubr.bf16.gmra.mrb[24].mxu1 %v339_v16  ;;  %v307_v23 = vadd.f32 %v810_v22, %v1084_v59  ;;  %v298_v24 = vpop.f32.mrb[31].mxu0 }
 0x119   :  { %v299_v25 = vadd.f32 %v1084_v59, %v298_v24  ;;  %v1143_v59 = vld [vmem:[%s1270_s4] ss:$0 sm:$0xff] }
 0x11a   :  { %v325_v26 = vpack.c.bf16 %v307_v23, %v304_v19 }
 0x11b   :  { %v324_v27 = vpack.c.bf16 %v299_v25, %v296_v21 }
 0x11c   :  { %v341_v28 = vmax.bf16 %v896_v6, %v325_v26 }
 0x11d   :  { %v340_v29 = vmax.bf16 %v896_v6, %v324_v27 }
 0x11f   :  { %855 = vmatprep.mubr.bf16.mxu1 %v340_v29 }
 0x120   :  { %856 = vmatmul.mubr.bf16.gmra.mrb[28].mxu1 %v341_v28 }
 0x1bb   :  { %v829_v31 = vpop.f32.mrb[0].mxu1 }
 0x1bc   :  { %v447_v32 = vpop.f32.mrb[1].mxu1  ;;  %v1146_v34 = vadd.f32 %v829_v31, %v1143_v59 }
 0x1bd   :  { %v830_v33 = vpop.f32.mrb[2].mxu1  ;;  %v448_v37 = vadd.f32 %v1143_v59, %v447_v32 }
 0x1be   :  { %v1149_v35 = vadd.f32 %v830_v33, %v1143_v59  ;;  %v450_v36 = vpop.f32.mrb[3].mxu1 }
 0x1bf   :  { %v451_v38 = vadd.f32 %v1143_v59, %v450_v36 }
 0x1c0   :  { %v575_v39 = vpack.c.bf16 %v1149_v35, %v1146_v34 }
 0x1c1   :  { %v574_v40 = vpack.c.bf16 %v451_v38, %v448_v37 }
 0x1c2   :  { %v591_v35 = vmax.bf16 %v896_v6, %v575_v39 }
 0x1c3   :  { %v833_v41 = vpop.f32.mrb[4].mxu1  ;;  %v590_v21 = vmax.bf16 %v896_v6, %v574_v40 }
 0x1c4   :  { %v463_v42 = vpop.f32.mrb[5].mxu1  ;;  %v1156_v44 = vadd.f32 %v833_v41, %v1143_v59 }
 0x1c5   :  { %v834_v43 = vpop.f32.mrb[6].mxu1  ;;  %v1162_v47 = vadd.f32 %v1143_v59, %v463_v42 }
 0x1c6   :  { %v1159_v45 = vadd.f32 %v834_v43, %v1143_v59  ;;  %v466_v46 = vpop.f32.mrb[7].mxu1 }
 0x1c7   :  { %v1165_v48 = vadd.f32 %v1143_v59, %v466_v46 }
 0x1c8   :  { %v577_v49 = vpack.c.bf16 %v1159_v45, %v1156_v44 }
 0x1c9   :  { %v576_v50 = vpack.c.bf16 %v1165_v48, %v1162_v47 }
 0x1cb   :  { %v837_v51 = vpop.f32.mrb[8].mxu1 }
 0x1cc   :  { %v479_v52 = vpop.f32.mrb[9].mxu1  ;;  %v1172_v54 = vadd.f32 %v837_v51, %v1143_v59  ;;  %v592_v51 = vmax.bf16 %v896_v6, %v576_v50  ;;  %v593_v50 = vmax.bf16 %v896_v6, %v577_v49 }
 0x1cd   :  { %v838_v53 = vpop.f32.mrb[10].mxu1  ;;  %v1178_v57 = vadd.f32 %v1143_v59, %v479_v52 }
 0x1ce   :  { %v1175_v55 = vadd.f32 %v838_v53, %v1143_v59  ;;  %v482_v56 = vpop.f32.mrb[11].mxu1 }
 0x1cf   :  { %v1181_v58 = vadd.f32 %v1143_v59, %v482_v56 }
 0x1d0   :  { %v579_v60 = vpack.c.bf16 %v1175_v55, %v1172_v54  ;;  %v897_v54 = vmov 1966171168  }
 0x1d1   :  { %v578_v61 = vpack.c.bf16 %v1181_v58, %v1178_v57  ;;  %v654_v55 = vunpack.c.l.s4 %v897_v54  ;;  %v656_v58 = vlaneseq }
 0x1d2   :  { %v595_v44 = vmax.bf16 %v896_v6, %v579_v60  ;;  %v608_v60 = vstv %s1272_s6 }
 0x1d3   :  { %v841_v62 = vpop.f32.mrb[12].mxu1  ;;  %vm670_vm1 = vcmp.lt.s32.totalorder %v656_v58, 256 }
 0x1d4   :  { %v495_v63 = vpop.f32.mrb[13].mxu1  ;;  %v1188_v1 = vadd.f32 %v841_v62, %v1143_v59 }
 0x1d5   :  { %v842_v0 = vpop.f32.mrb[14].mxu1  ;;  %v1194_v4 = vadd.f32 %v1143_v59, %v495_v63 }
 0x1d6   :  { %v1191_v2 = vadd.f32 %v842_v0, %v1143_v59  ;;  %v498_v3 = vpop.f32.mrb[15].mxu1 }
 0x1d7   :  { %v1197_v5 = vadd.f32 %v1143_v59, %v498_v3 }
 0x1d8   :  { %v581_v7 = vpack.c.bf16 %v1191_v2, %v1188_v1 }
 0x1d9   :  { %v580_v8 = vpack.c.bf16 %v1197_v5, %v1194_v4  ;;  %v657_v4 = vshrl.u32 %v656_v58, 7 }
 0x1da   :  { %v597_v57 = vmax.bf16 %v896_v6, %v581_v7 }
 0x1db   :  { %v845_v9 = vpop.f32.mrb[16].mxu1  ;;  %v596_v45 = vmax.bf16 %v896_v6, %v580_v8 }
 0x1dc   :  { %v511_v10 = vpop.f32.mrb[17].mxu1  ;;  %v520_v12 = vadd.f32 %v845_v9, %v1143_v59 }
 0x1dd   :  { %v846_v11 = vpop.f32.mrb[18].mxu1  ;;  %v512_v15 = vadd.f32 %v1143_v59, %v511_v10 }
 0x1de   :  { %v523_v13 = vadd.f32 %v846_v11, %v1143_v59  ;;  %v514_v14 = vpop.f32.mrb[19].mxu1 }
 0x1df   :  { %v515_v16 = vadd.f32 %v1143_v59, %v514_v14 }
 0x1e0   :  { %v583_v17 = vpack.c.bf16 %v523_v13, %v520_v12  ;;  %v594_v12 = vmax.bf16 %v896_v6, %v578_v61  ;;  %v655_v61 = vunpack.c.0.s8 %v654_v55 }
 0x1e1   :  { %v582_v18 = vpack.c.bf16 %v515_v16, %v512_v15 }
 0x1e2   :  { %v599_v26 = vmax.bf16 %v896_v6, %v583_v17  ;;  %v658_v16 = vsub.s32 %v655_v61, %v657_v4 }
 0x1e3   :  { %v849_v19 = vpop.f32.mrb[20].mxu1  ;;  %v598_v20 = vmax.bf16 %v896_v6, %v582_v18 }
 0x1e4   :  { %v536_v22 = vadd.f32 %v849_v19, %v1143_v59  ;;  %v527_v23 = vpop.f32.mrb[21].mxu1 }
 0x1e5   :  { %v528_v24 = vadd.f32 %v1143_v59, %v527_v23  ;;  %757 = vmatprep.subr.bf16.mxu0 %v598_v20  ;;  %v850_v25 = vpop.f32.mrb[22].mxu1 }
 0x1e6   :  { %v539_v27 = vadd.f32 %v850_v25, %v1143_v59  ;;  %758 = vmatpush3.bf16.xpose.msra.mxu0 %v590_v21  ;;  %v530_v28 = vpop.f32.mrb[23].mxu1 }
 0x1e7   :  { %v531_v29 = vadd.f32 %v1143_v59, %v530_v28  ;;  %759 = vmatprep.subr.bf16.mxu0 %v599_v26 }
 0x1e8   :  { %v585_v31 = vpack.c.bf16 %v539_v27, %v536_v22 }
 0x1e9   :  { %v584_v32 = vpack.c.bf16 %v531_v29, %v528_v24 }
 0x1ea   :  { %v601_v53 = vmax.bf16 %v896_v6, %v585_v31 }
 0x1eb   :  { %v600_v33 = vmax.bf16 %v896_v6, %v584_v32  ;;  %v853_v34 = vpop.f32.mrb[24].mxu1 }
 0x1ec   :  { %v552_v36 = vadd.f32 %v853_v34, %v1143_v59  ;;  %v543_v37 = vpop.f32.mrb[25].mxu1 }
 0x1ed   :  { %v544_v38 = vadd.f32 %v1143_v59, %v543_v37  ;;  %v854_v40 = vpop.f32.mrb[26].mxu1 }
 0x1ee   :  { %760 = vmatpush3.bf16.xpose.msra.mxu0 %v591_v35  ;;  %v555_v41 = vadd.f32 %v854_v40, %v1143_v59  ;;  %v546_v42 = vpop.f32.mrb[27].mxu1 }
 0x1ef   :  { %761 = vmatprep.subr.bf16.mxu0 %v600_v33  ;;  %v547_v43 = vadd.f32 %v1143_v59, %v546_v42 }
 0x1f0   :  { %v587_v46 = vpack.c.bf16 %v555_v41, %v552_v36 }
 0x1f1   :  { %v586_v47 = vpack.c.bf16 %v547_v43, %v544_v38 }
 0x1f2   :  { %v603_v13 = vmax.bf16 %v896_v6, %v587_v46 }
 0x1f3   :  { %v857_v48 = vpop.f32.mrb[28].mxu1  ;;  %v602_v11 = vmax.bf16 %v896_v6, %v586_v47 }
 0x1f4   :  { %v568_v39 = vadd.f32 %v857_v48, %v1143_v59  ;;  %v559_v52 = vpop.f32.mrb[29].mxu1 }
 0x1f5   :  { %v560_v56 = vadd.f32 %v1143_v59, %v559_v52  ;;  %v858_v62 = vpop.f32.mrb[30].mxu1 }
 0x1f6   :  { %762 = vmatpush3.bf16.xpose.msra.mxu0 %v592_v51  ;;  %v571_v63 = vadd.f32 %v858_v62, %v1143_v59  ;;  %v562_v0 = vpop.f32.mrb[31].mxu1 }
 0x1f7   :  { %763 = vmatprep.subr.bf16.mxu0 %v601_v53  ;;  %v563_v3 = vadd.f32 %v1143_v59, %v562_v0 }
 0x1f8   :  { %v589_v9 = vpack.c.bf16 %v571_v63, %v568_v39 }
 0x1f9   :  { %v588_v10 = vpack.c.bf16 %v563_v3, %v560_v56 }
 0x1fa   :  { %v605_v49 = vmax.bf16 %v896_v6, %v589_v9 }
 0x1fb   :  { %v604_v59 = vmax.bf16 %v896_v6, %v588_v10 }
 0x1fe   :  { %764 = vmatpush3.bf16.xpose.msra.mxu0 %v593_v50 }
 0x1ff   :  { %765 = vmatprep.subr.bf16.mxu0 %v602_v11 }
 0x206   :  { %766 = vmatpush3.bf16.xpose.msra.mxu0 %v594_v12 }
 0x207   :  { %767 = vmatprep.subr.bf16.mxu0 %v603_v13 }
 0x20e   :  { %768 = vmatpush3.bf16.xpose.msra.mxu0 %v595_v44 }
 0x20f   :  { %769 = vmatprep.subr.bf16.mxu0 %v604_v59 }
 0x216   :  { %770 = vmatpush3.bf16.xpose.msra.mxu0 %v596_v45 }
 0x217   :  { %771 = vmatprep.subr.bf16.mxu0 %v605_v49 }
 0x21e   :  { %772 = vmatpush3.bf16.xpose.msra.mxu0 %v597_v57 }
 0x225   :  { %774 = vmatmul.mubr.bf16.vlgmr.msra.gmra.mrb[32].mxu0 %v1137_v30 }
 0x2f8   :  { %v643_v5 = vpop.f32.mrb[32].mxu0 }
 0x2f9   :  { %v644_v8 = vadd.f32 %v643_v5, %v608_v60  ;;  %v645_v14 = vpop.f32.mrb[33].mxu0 }
 0x2fa   :  { %v646_v15 = vadd.f32 %v645_v14, %v608_v60  ;;  %v647_v1 = vpop.f32.mrb[34].mxu0 }
 0x2fb   :  { %v648_v2 = vpop.f32.mrb[35].mxu0 }
 0x2fc   :  { %v652_v6 = vcombine.low %v644_v8, %v646_v15 }
 0x2fe   :  { %v659_v30 = vrot.slane %v652_v6, %v658_v16 }
 0x300   :  { %v666_v7 = vrot.slane %v659_v30, %v658_v16 }
 0x302   :  { %672 = vst.msk [vmem:[#allocation3] sm:$0x3] %vm670_vm1, %v666_v7 }
 0x303   :  { %883 = shalt.err (!%p880_p4)
}
 0x304   :  { %s884_s19 = scalar_lea.hbm %s1273_s7, 32 }
 0x305   :  { %p885_p5 = scmp.ne.s32.totalorder %s1273_s7, %s884_s19  ;;  %p888_p6 = scmp.lt.u32.totalorder %s884_s19, %s1273_s7 }
 0x307   :  { %p890_p7 = pnand %p888_p6, %p885_p5 }
 0x309   :  { %893 = shalt.err (!%p890_p7)
}
 0x30a   :  { %682 = dma.vmem_to_hbm [thread:$0]  %s680_s16, 32, %s1273_s7, [#allocation4]  }
 0x30b   :  { %894 = dma.done.wait [#allocation4], 32  }
 0x30c   :  { %895 = vsyncadd [#allocation4], 4294967264 }
 0x30d   :  { %686 = vsyncpa [#allocation4], 1 }

</bundles_post_ra>
